<compile_context>
chip_gen: v7x
topology: tpu7x:2x2x1
jax: 0.10.0
libtpu: 0.0.40
codegen_flags: <defaults>
</compile_context>

<pallas_src>
import math

import jax
import jax.numpy as jnp
from jax.experimental import pallas as pl
from jax.experimental.pallas import tpu as pltpu


# ----------------------------- block sizing ---------------------------------

def _pick_bm(B, cap):
    """Largest multiple-of-8 divisor of B that is <= cap, preferring a split
    into >= 2 blocks (so v7x's two TensorCores both get work along the
    'parallel' grid axis).  Falls back to bm == B (always legal: block dim ==
    full array dim) when B has no multiple-of-8 divisor."""
    cands = [bm for bm in range(8, min(B, cap) + 1, 8) if B % bm == 0]
    if not cands:
        return B
    two_blocks = [bm for bm in cands if B // bm >= 2]
    return max(two_blocks) if two_blocks else max(cands)


# ----------------------------- KG kernel ------------------------------------

def _kg_kernel(h_ref, r_ref, pt_ref, nt_ref, rel_ref, mr_ref, out_ref):
    f32 = jnp.float32
    h = h_ref[...].astype(f32)        # (bm, D)
    r = r_ref[...].astype(f32)        # (bm, D)
    pt = pt_ref[...].astype(f32)      # (bm, D)
    nt = nt_ref[...].astype(f32)      # (bm, D)
    rel = rel_ref[...]                # (bm, 1) int32
    mr2d = mr_ref[...]                # (n_rels*D, D); row (k*D+d) = Mr[k, d, :]

    bm, D = h.shape
    KD = mr2d.shape[0]
    n_rels = KD // D

    # Per-example relation mask over the stacked (relation, in-dim) contraction
    # axis.  Range-compare form (no integer division), lane-dense width KD.
    # NOTE: relation ids must lie in [0, n_rels); out-of-range ids would
    # silently zero the TransR projection.
    lane = jax.lax.broadcasted_iota(jnp.int32, (bm, KD), 1)
    low = rel * D                                               # (bm, 1)
    sel = ((lane >= low) & (lane < low + D)).astype(f32)        # (bm, KD)

    # Fused TransR: a single MXU matmul for h, pos_t and neg_t (shared RHS).
    x3 = jnp.concatenate([h, pt, nt], axis=0)                   # (3bm, D)
    sel3 = jnp.tile(sel, (3, 1))                                # (3bm, KD)
    y = (jnp.tile(x3, (1, n_rels)) * sel3).astype(mr2d.dtype)   # (3bm, KD)
    xm = jnp.dot(y, mr2d, preferred_element_type=f32)           # (3bm, D)
    h_m, pt_m, nt_m = xm[:bm], xm[bm:2 * bm], xm[2 * bm:]

    a = h_m + r
    pos = jnp.sum((a - pt_m) ** 2, axis=-1, keepdims=True)      # (bm, 1)
    neg = jnp.sum((a - nt_m) ** 2, axis=-1, keepdims=True)      # (bm, 1)

    # Stable log(sigmoid(.)) — avoids sigmoid underflow -> log(0) = -inf.
    ls = jax.nn.log_sigmoid(pos - neg)                          # (bm, 1)

    # Independent lane-dense partial sum per grid block; summed in the wrapper.
    out_ref[...] = jnp.broadcast_to(jnp.sum(ls), out_ref.shape).astype(out_ref.dtype)


def kg_loss_pallas(head_emb, rel_emb, pos_tail_emb, neg_tail_emb,
                   relations_id, mr_table, *, bm=None, bm_cap=2048,
                   matmul_dtype=jnp.float32):
    """head/rel/pos/neg_tail_emb: (B, D); relations_id: (B,) int;
    mr_table: (n_rels, D, D) — passed whole, NOT gathered per example.
    matmul_dtype=jnp.bfloat16 halves the resident-table footprint and runs the
    MXU at native bf16 rate (biggest win on v5e); default f32 keeps the torch
    module's numerics."""
    B, D = head_emb.shape
    n_rels = mr_table.shape[0]
    if bm is None:
        bm = _pick_bm(B, bm_cap)
    assert B % bm == 0, (B, bm)
    nb = B // bm

    rel_col = relations_id.astype(jnp.int32).reshape(B, 1)
    # Flatten the relation table once in the wrapper: row (k*D + d) = Mr[k, d, :].
    # It stays VMEM-resident across the grid (constant index_map).
    mr2d = mr_table.reshape(n_rels * D, D).astype(matmul_dtype)
    # TODO(synk): for large n_rels (>~8) switch to a relation-sorted grouped
    #             matmul (PrefetchScalarGridSpec, per-group offsets in the LHS
    #             index_map) — removes the n_rels-times redundant MXU FLOPs of
    #             the masked-LHS trick.
    # TODO(synk): (v7x) single-buffer the resident table (pipeline_mode=
    #             pl.Buffered(1)) once needed for very large n_rels*D*D.

    vec_spec = pl.BlockSpec((bm, D), lambda b: (b, 0))
    rel_spec = pl.BlockSpec((bm, 1), lambda b: (b, 0))
    mr_spec = pl.BlockSpec((n_rels * D, D), lambda b: (0, 0))    # resident
    out_spec = pl.BlockSpec((1, 1, 128), lambda b: (b, 0, 0))

    # Rough VMEM budget: double-buffered inputs/outputs + resident table (the
    # pipeline still allocates two buffers for a constant-index input) + the
    # in-kernel (3*bm, n_rels*D) masked-LHS temporaries.
    itemsize = jnp.dtype(matmul_dtype).itemsize
    est = (2 * (4 * bm * D * 4 + bm * 4 + 128 * 4)
           + 2 * n_rels * D * D * itemsize
           + 3 * bm * n_rels * D * (4 + itemsize))
    cp = dict(dimension_semantics=("parallel",))
    if est > (30 << 20):
        cp["vmem_limit_bytes"] = int(min(est + (8 << 20), 100 << 20))

    partial = pl.pallas_call(
        _kg_kernel,
        out_shape=jax.ShapeDtypeStruct((nb, 1, 128), jnp.float32),
        grid=(nb,),
        in_specs=[vec_spec, vec_spec, vec_spec, vec_spec, rel_spec, mr_spec],
        out_specs=out_spec,
        compiler_params=pltpu.CompilerParams(**cp),
    )(head_emb, rel_emb, pos_tail_emb, neg_tail_emb, rel_col, mr2d)
    return jnp.sum(partial[:, 0, 0])


# ----------------------------- CF kernel ------------------------------------

def _cf_kernel(u_ref, p_ref, n_ref, out_ref):
    f32 = jnp.float32
    u = u_ref[...].astype(f32)
    p = p_ref[...].astype(f32)
    n = n_ref[...].astype(f32)

    # <u, p> - <u, n> == <u, p - n>: one elementwise pass, one lane reduce.
    # TODO(synk): if profiling shows VPU/XLU (not DMA) binding at D << 128
    #             (most likely v7x), pack 4 examples per 128-lane row
    #             wrapper-side for full lane utilization.
    x = jnp.sum(u * (p - n), axis=-1, keepdims=True)            # (bm, 1)
    ls = jax.nn.log_sigmoid(x)                                   # (bm, 1)
    out_ref[...] = jnp.broadcast_to(jnp.sum(ls), out_ref.shape).astype(out_ref.dtype)


def cf_loss_pallas(users_emb, pos_items_emb, neg_items_emb, *, bm=None, bm_cap=4096):
    B, D = users_emb.shape
    if bm is None:
        bm = _pick_bm(B, bm_cap)
    assert B % bm == 0, (B, bm)
    nb = B // bm

    vec_spec = pl.BlockSpec((bm, D), lambda b: (b, 0))
    out_spec = pl.BlockSpec((1, 1, 128), lambda b: (b, 0, 0))

    partial = pl.pallas_call(
        _cf_kernel,
        out_shape=jax.ShapeDtypeStruct((nb, 1, 128), jnp.float32),
        grid=(nb,),
        in_specs=[vec_spec, vec_spec, vec_spec],
        out_specs=out_spec,
        compiler_params=pltpu.CompilerParams(
            dimension_semantics=("parallel",)),
    )(users_emb, pos_items_emb, neg_items_emb)
    return jnp.sum(partial[:, 0, 0])


# --------------------------- CKE module wrapper ------------------------------

def xavier_uniform(key, shape):
    """Deterministic torch-style xavier_uniform_."""
    if len(shape) == 2:
        fan_in, fan_out = shape[1], shape[0]
    else:
        rf = math.prod(shape[2:])
        fan_in, fan_out = shape[1] * rf, shape[0] * rf
    bound = math.sqrt(6.0 / (fan_in + fan_out))
    return jax.random.uniform(key, shape, jnp.float32, -bound, bound)


def init_cke_params(key, n_entity, n_user, n_item, n_rels, dim):
    ks = jax.random.split(key, 5)
    return {
        "user_emb_matrix": xavier_uniform(ks[0], (n_user, dim)),
        "item_emb_matrix": xavier_uniform(ks[1], (n_item, dim)),
        "ent_emb_matrix": xavier_uniform(ks[2], (n_entity, dim)),
        "Mr_matrix": xavier_uniform(ks[3], (n_rels, dim, dim)),
        "rel_emb_matrix": xavier_uniform(ks[4], (n_rels, dim)),
    }


def cke_forward(params, data, name):
    """data: int array (B,4) for 'kg' ([h, r, pos_t, neg_t]) or (B,3) otherwise
    ([user, pos_item, neg_item])."""
    if name == "kg":
        heads_id, relations_id = data[:, 0], data[:, 1]
        pos_tails_id, neg_tails_id = data[:, 2], data[:, 3]
        head_emb = params["ent_emb_matrix"][heads_id]
        rel_emb = params["rel_emb_matrix"][relations_id]
        pos_tail_emb = params["ent_emb_matrix"][pos_tails_id]
        neg_tail_emb = params["ent_emb_matrix"][neg_tails_id]
        # No per-example (B, D, D) Mr gather: pass ids + whole table.
        return kg_loss_pallas(head_emb, rel_emb, pos_tail_emb, neg_tail_emb,
                              relations_id, params["Mr_matrix"])
    else:
        users_id, poss_id, negs_id = data[:, 0], data[:, 1], data[:, 2]
        users_emb = params["user_emb_matrix"][users_id]
        pos_items_emb = (params["item_emb_matrix"][poss_id]
                         + params["ent_emb_matrix"][poss_id])
        neg_items_emb = (params["item_emb_matrix"][negs_id]
                         + params["ent_emb_matrix"][negs_id])
        return cf_loss_pallas(users_emb, pos_items_emb, neg_items_emb)


# --------------------------- pure-JAX reference ------------------------------

def cke_forward_ref(params, data, name):
    if name == "kg":
        h = params["ent_emb_matrix"][data[:, 0]]
        r = params["rel_emb_matrix"][data[:, 1]]
        pt = params["ent_emb_matrix"][data[:, 2]]
        nt = params["ent_emb_matrix"][data[:, 3]]
        mr = params["Mr_matrix"][data[:, 1]]
        h_m = jnp.einsum("bd,bde->be", h, mr)
        pt_m = jnp.einsum("bd,bde->be", pt, mr)
        nt_m = jnp.einsum("bd,bde->be", nt, mr)
        pos = jnp.sum((h_m + r - pt_m) ** 2, axis=-1)
        neg = jnp.sum((h_m + r - nt_m) ** 2, axis=-1)
        return jnp.sum(jnp.log(jax.nn.sigmoid(pos - neg)))
    else:
        u = params["user_emb_matrix"][data[:, 0]]
        p = params["item_emb_matrix"][data[:, 1]] + params["ent_emb_matrix"][data[:, 1]]
        n = params["item_emb_matrix"][data[:, 2]] + params["ent_emb_matrix"][data[:, 2]]
        pos = jnp.sum(u * p, axis=1)
        neg = jnp.sum(u * n, axis=1)
        return jnp.sum(jnp.log(jax.nn.sigmoid(pos - neg)))


# --------------------------------- main --------------------------------------

if __name__ == "__main__":
    n_entity, n_user, n_item, n_rels, dim = 64, 32, 48, 4, 32
    B = 16   # -> bm = 8, nb = 2 (exercises the multi-block / megacore path)

    key = jax.random.PRNGKey(0)
    pkey, dkey = jax.random.split(key)
    params = init_cke_params(pkey, n_entity, n_user, n_item, n_rels, dim)

    k1, k2, k3, k4, k5, k6, k7 = jax.random.split(dkey, 7)
    kg_data = jnp.stack([
        jax.random.randint(k1, (B,), 0, n_entity),
        jax.random.randint(k2, (B,), 0, n_rels),
        jax.random.randint(k3, (B,), 0, n_entity),
        jax.random.randint(k4, (B,), 0, n_entity),
    ], axis=1)
    cf_data = jnp.stack([
        jax.random.randint(k5, (B,), 0, n_user),
        jax.random.randint(k6, (B,), 0, n_item),
        jax.random.randint(k7, (B,), 0, n_item),
    ], axis=1)

    kg_loss = jax.block_until_ready(cke_forward(params, kg_data, "kg"))
    cf_loss = jax.block_until_ready(cke_forward(params, cf_data, "cf"))

    kg_ref = cke_forward_ref(params, kg_data, "kg")
    cf_ref = cke_forward_ref(params, cf_data, "cf")

    assert jnp.allclose(kg_loss, kg_ref, rtol=1e-4, atol=1e-4), (kg_loss, kg_ref)
    assert jnp.allclose(cf_loss, cf_ref, rtol=1e-4, atol=1e-4), (cf_loss, cf_ref)

    print("KERNEL_OK")
</pallas_src>

<mosaic_0001>
module attributes {stable_mosaic.version = 11 : i64} {
  func.func @_kg_kernel(%arg0: i32, %arg1: memref<8x32xf32, #tpu.memory_space<vmem>>, %arg2: memref<8x32xf32, #tpu.memory_space<vmem>>, %arg3: memref<8x32xf32, #tpu.memory_space<vmem>>, %arg4: memref<8x32xf32, #tpu.memory_space<vmem>>, %arg5: memref<8x1xi32, #tpu.memory_space<vmem>>, %arg6: memref<128x32xf32, #tpu.memory_space<vmem>>, %arg7: memref<1x1x128xf32, #tpu.memory_space<vmem>>) attributes {dimension_semantics = [#tpu.dimension_semantics<parallel>], iteration_bounds = array<i64: 2>, scalar_prefetch = 0 : i64, scratch_operands = 0 : i64, tpu.core_type = #tpu.core_type<tc>, window_params = [{transform_indices = @transform_0, window_bounds = array<i64: 8, 32>}, {transform_indices = @transform_1, window_bounds = array<i64: 8, 32>}, {transform_indices = @transform_2, window_bounds = array<i64: 8, 32>}, {transform_indices = @transform_3, window_bounds = array<i64: 8, 32>}, {transform_indices = @transform_4, window_bounds = array<i64: 8, 1>}, {pipeline_mode = #tpu.pipeline_mode<synchronous>, transform_indices = @transform_5, window_bounds = array<i64: 128, 32>}, {transform_indices = @transform_6, window_bounds = array<i64: 1, 1, 128>}]} {
    %c0 = arith.constant 0 : index
    %c0_0 = arith.constant 0 : index
    %0 = vector.load %arg1[%c0, %c0_0] : memref<8x32xf32, #tpu.memory_space<vmem>>, vector<8x32xf32>
    %c0_1 = arith.constant 0 : index
    %c0_2 = arith.constant 0 : index
    %1 = vector.load %arg2[%c0_1, %c0_2] : memref<8x32xf32, #tpu.memory_space<vmem>>, vector<8x32xf32>
    %c0_3 = arith.constant 0 : index
    %c0_4 = arith.constant 0 : index
    %2 = vector.load %arg3[%c0_3, %c0_4] : memref<8x32xf32, #tpu.memory_space<vmem>>, vector<8x32xf32>
    %c0_5 = arith.constant 0 : index
    %c0_6 = arith.constant 0 : index
    %3 = vector.load %arg4[%c0_5, %c0_6] : memref<8x32xf32, #tpu.memory_space<vmem>>, vector<8x32xf32>
    %c0_7 = arith.constant 0 : index
    %c0_8 = arith.constant 0 : index
    %4 = vector.load %arg5[%c0_7, %c0_8] : memref<8x1xi32, #tpu.memory_space<vmem>>, vector<8x1xi32>
    %c0_9 = arith.constant 0 : index
    %c0_10 = arith.constant 0 : index
    %5 = vector.load %arg6[%c0_9, %c0_10] : memref<128x32xf32, #tpu.memory_space<vmem>>, vector<128x32xf32>
    %6 = tpu.iota {dimensions = array<i32: 1>} : vector<8x128xi32>
    %c32_i32 = arith.constant 32 : i32
    %7 = vector.broadcast %c32_i32 : i32 to vector<8x1xi32>
    %8 = arith.muli %4, %7 : vector<8x1xi32>
    %9 = vector.broadcast %8 : vector<8x1xi32> to vector<8x128xi32>
    %10 = arith.cmpi sge, %6, %9 : vector<8x128xi32>
    %c32_i32_11 = arith.constant 32 : i32
    %11 = vector.broadcast %c32_i32_11 : i32 to vector<8x1xi32>
    %12 = arith.addi %8, %11 : vector<8x1xi32>
    %13 = vector.broadcast %12 : vector<8x1xi32> to vector<8x128xi32>
    %14 = arith.cmpi slt, %6, %13 : vector<8x128xi32>
    %15 = arith.andi %10, %14 : vector<8x128xi1>
    %16 = arith.extui %15 : vector<8x128xi1> to vector<8x128xi32>
    %17 = arith.sitofp %16 : vector<8x128xi32> to vector<8x128xf32>
    %18 = tpu.concatenate %0, %2, %3 in 0 : vector<8x32xf32>, vector<8x32xf32>, vector<8x32xf32> -> vector<24x32xf32>
    %19 = tpu.concatenate %17, %17, %17 in 0 : vector<8x128xf32>, vector<8x128xf32>, vector<8x128xf32> -> vector<24x128xf32>
    %20 = tpu.concatenate %18, %18, %18, %18 in 1 : vector<24x32xf32>, vector<24x32xf32>, vector<24x32xf32>, vector<24x32xf32> -> vector<24x128xf32>
    %21 = arith.mulf %20, %19 : vector<24x128xf32>
    %cst = arith.constant dense<0.000000e+00> : vector<24x32xf32>
    %22 = tpu.matmul %21, %5, %cst {dimension_numbers = #tpu.dot_dimension_numbers<[1], [0], [0], [1], [0, 0, 1, 1], [], []>} : vector<24x128xf32>, vector<128x32xf32>, vector<24x32xf32> -> vector<24x32xf32>
    %23 = vector.extract_strided_slice %22 {offsets = [0, 0], sizes = [8, 32], strides = [1, 1]} : vector<24x32xf32> to vector<8x32xf32>
    %24 = vector.extract_strided_slice %22 {offsets = [8, 0], sizes = [8, 32], strides = [1, 1]} : vector<24x32xf32> to vector<8x32xf32>
    %25 = vector.extract_strided_slice %22 {offsets = [16, 0], sizes = [8, 32], strides = [1, 1]} : vector<24x32xf32> to vector<8x32xf32>
    %26 = arith.addf %23, %1 : vector<8x32xf32>
    %27 = arith.subf %26, %24 : vector<8x32xf32>
    %28 = arith.mulf %27, %27 : vector<8x32xf32>
    %cst_12 = arith.constant dense<0.000000e+00> : vector<8xf32>
    %29 = vector.multi_reduction <add>, %28, %cst_12 [1] : vector<8x32xf32> to vector<8xf32>
    %30 = vector.shape_cast %29 : vector<8xf32> to vector<8x1xf32>
    %31 = arith.subf %26, %25 : vector<8x32xf32>
    %32 = arith.mulf %31, %31 : vector<8x32xf32>
    %cst_13 = arith.constant dense<0.000000e+00> : vector<8xf32>
    %33 = vector.multi_reduction <add>, %32, %cst_13 [1] : vector<8x32xf32> to vector<8xf32>
    %34 = vector.shape_cast %33 : vector<8xf32> to vector<8x1xf32>
    %35 = arith.subf %30, %34 : vector<8x1xf32>
    %cst_14 = arith.constant 0.000000e+00 : f32
    %36 = vector.broadcast %cst_14 : f32 to vector<8x1xf32>
    %37 = arith.subf %36, %35 : vector<8x1xf32>
    %cst_15 = arith.constant 0.000000e+00 : f32
    %38 = vector.broadcast %cst_15 : f32 to vector<8x1xf32>
    %39 = arith.maximumf %37, %38 : vector<8x1xf32>
    %40 = vector.broadcast %cst_15 : f32 to vector<8x1xf32>
    %41 = arith.subf %37, %40 : vector<8x1xf32>
    %42 = arith.cmpf one, %41, %41 : vector<8x1xf32>
    %43 = vector.broadcast %cst_15 : f32 to vector<8x1xf32>
    %44 = arith.addf %37, %43 : vector<8x1xf32>
    %45 = math.absf %41 : vector<8x1xf32>
    %cst_16 = arith.constant 0.000000e+00 : f32
    %46 = vector.broadcast %cst_16 : f32 to vector<8x1xf32>
    %47 = arith.subf %46, %45 : vector<8x1xf32>
    %48 = math.exp %47 : vector<8x1xf32>
    %49 = math.log1p %48 : vector<8x1xf32>
    %50 = arith.addf %39, %49 : vector<8x1xf32>
    %51 = arith.select %42, %44, %50 : vector<8x1xi1>, vector<8x1xf32>
    %cst_17 = arith.constant 0.000000e+00 : f32
    %52 = vector.broadcast %cst_17 : f32 to vector<8x1xf32>
    %53 = arith.subf %52, %51 : vector<8x1xf32>
    %54 = vector.shape_cast %53 : vector<8x1xf32> to vector<1x8x1xf32>
    %cst_18 = arith.constant dense<0.000000e+00> : vector<1xf32>
    %55 = vector.multi_reduction <add>, %54, %cst_18 [1, 2] : vector<1x8x1xf32> to vector<1xf32>
    %56 = vector.shape_cast %55 : vector<1xf32> to vector<1x1x1xf32>
    %57 = vector.extract %56[0, 0, 0] : f32 from vector<1x1x1xf32>
    %58 = vector.broadcast %57 : f32 to vector<1x1x128xf32>
    %c0_19 = arith.constant 0 : index
    %c0_20 = arith.constant 0 : index
    %c0_21 = arith.constant 0 : index
    %59 = vector.load %arg7[%c0_19, %c0_20, %c0_21] : memref<1x1x128xf32, #tpu.memory_space<vmem>>, vector<1x1x128xf32>
    tpu.vector_store %arg7[%c0_19, %c0_20, %c0_21], %58 {strides = array<i32>} : memref<1x1x128xf32, #tpu.memory_space<vmem>>, vector<1x1x128xf32>,
    return
  }
  func.func @transform_0(%arg0: i32) -> (i32, i32) {
    %c0_i32 = arith.constant 0 : i32
    %c0_i32_0 = arith.constant 0 : i32
    return %arg0, %c0_i32 : i32, i32
  }
  func.func @transform_1(%arg0: i32) -> (i32, i32) {
    %c0_i32 = arith.constant 0 : i32
    %c0_i32_0 = arith.constant 0 : i32
    return %arg0, %c0_i32 : i32, i32
  }
  func.func @transform_2(%arg0: i32) -> (i32, i32) {
    %c0_i32 = arith.constant 0 : i32
    %c0_i32_0 = arith.constant 0 : i32
    return %arg0, %c0_i32 : i32, i32
  }
  func.func @transform_3(%arg0: i32) -> (i32, i32) {
    %c0_i32 = arith.constant 0 : i32
    %c0_i32_0 = arith.constant 0 : i32
    return %arg0, %c0_i32 : i32, i32
  }
  func.func @transform_4(%arg0: i32) -> (i32, i32) {
    %c0_i32 = arith.constant 0 : i32
    %c0_i32_0 = arith.constant 0 : i32
    return %arg0, %c0_i32 : i32, i32
  }
  func.func @transform_5(%arg0: i32) -> (i32, i32) {
    %c0_i32 = arith.constant 0 : i32
    %c0_i32_0 = arith.constant 0 : i32
    %c0_i32_1 = arith.constant 0 : i32
    return %c0_i32, %c0_i32_0 : i32, i32
  }
  func.func @transform_6(%arg0: i32) -> (i32, i32, i32) {
    %c0_i32 = arith.constant 0 : i32
    %c0_i32_0 = arith.constant 0 : i32
    %c0_i32_1 = arith.constant 0 : i32
    return %arg0, %c0_i32, %c0_i32_0 : i32, i32, i32
  }
}

</mosaic_0001>

<bundles_post_ra>
// kernel: tpu_custom_call.1
= control target key start
LH: loop header
LB: loop body
LE: loop exit
PB: predicated region body
PF: predicated region fallthrough
CT: control target
= control target key end

     0   :  { %11 = vsyncpa [#allocation3], 0  ;;  %s1124_s0 = inlined_call_operand.vmem [shape: f32[16,32], index: 0, kind: input, shape index: {}]   ;;  %s1125_s1 = inlined_call_operand.vmem [shape: f32[16,32], index: 1, kind: input, shape index: {}]   ;;  %s1126_s2 = inlined_call_operand.vmem [shape: f32[16,32], index: 2, kind: input, shape index: {}]   ;;  %s1127_s3 = inlined_call_operand.vmem [shape: f32[16,32], index: 3, kind: input, shape index: {}]   ;;  %s1128_s4 = inlined_call_operand.vmem [shape: s32[16,1], index: 4, kind: input, shape index: {}]   ;;  %s1129_s5 = inlined_call_operand.vmem [shape: f32[128,32], index: 5, kind: input, shape index: {}]   ;;  %s1130_s6 = inlined_call_operand.hbm [shape: f32[2,1,128], index: 6, kind: output, shape index: {}]  }
   0x1   :  { %13 = vsyncpa [#allocation3 + $0x1], 0  ;;  %s909_s21 = smov 0   ;;  %s911_s22 = smov 0  }
   0x2   :  { %s913_s23 = smov 0   ;;  %s915_s24 = smov 0  }
   0x3 LB: > { %s930_s25 = sadd.s32 4294967295, %s864_s24   ;;  %s636_s26 = sadd.s32 4294967294, %s864_s24   ;;  %s864_s24 = sphi %s915_s24, %s1136_s24   ;;  %s860_s23 = sphi %s913_s23, %s1135_s23   ;;  %s856_s22 = sphi %s911_s22, %s1134_s22   ;;  %s852_s21 = sphi %s909_s21, %s1133_s21  }
   0x4   : > { %s934_s27 = sadd.s32 1, %s864_s24   ;;  %s177_s28 = sadd.s32 1, %s860_s23 }
   0x5   : > { %s174_s29 = ssub.s32 %s864_s24, %s934_s27  ;;  %p187_p0 = scmp.ne.s32.totalorder %s860_s23, %s856_s22 }
   0x6   : > { %p175_p1 = scmp.eq.s32.totalorder %s174_s29, 0  ;;  %p188_p2 = scmp.eq.s32.totalorder %s930_s25, 1 }
   0x7   : > { %p193_p3 = scmp.ne.s32.totalorder %s856_s22, %s852_s21  ;;  %p194_p4 = scmp.eq.s32.totalorder %s636_s26, 1 }
   0x8   : > { %s945_s30 = scalar_select %p175_p1, %s860_s23, %s177_s28  }
   0x9   : > { %p947_p5 = por %p188_p2, %p187_p0  ;;  %p951_p6 = por %p194_p4, %p193_p3 }
   0xa   : > { %p639_p7 = scmp.ge.s32.totalorder %s864_s24, 1  ;;  %p250_p8 = scmp.lt.s32.totalorder %s864_s24, 3 }
   0xc   : > { %p251_p9 = pnand %p639_p7, %p250_p8 }
   0xd   : > { %p294_p10 = scmp.lt.s32.totalorder (!%p251_p9), %s930_s25, 1  ;;  %v319_v0 = vld [vmem:[%s1129_s5] sm:$0xff] (!%p251_p9)  ;;  %v320_v1 = vld [vmem:[%s1129_s5 + $0x8] sm:$0xff] (!%p251_p9)  ;;  %v866_v2 = vmov (!%p251_p9), 0   ;;  %v867_v3 = vmov (!%p251_p9), 0.0|0.0   ;;  %v321_v5 = vld [vmem:[%s1129_s5 + $0x10] sm:$0xff] (!%p251_p9)  ;;  %v335_v36 = vlaneseq (!%p251_p9) }
   0xe   : > { %254 = sbr.rel (%p251_p9) target bundleno = 798 (0x31e), region = 44  ;;  %797 = vset.pattern.permute.xlu0 (!%p251_p9), %v866_v2  ;;  %733 = vmatprep.subr.bf16.mxu1 (!%p251_p9), %v867_v3  ;;  %v710_v4 = vpack.c.bf16 (!%p251_p9), %v320_v1, %v319_v0  ;;  %v322_v6 = vld [vmem:[%s1129_s5 + $0x18] sm:$0xff] (!%p251_p9)  ;;  %v323_v8 = vld [vmem:[%s1129_s5 + $0x20] sm:$0xff] (!%p251_p9)  ;;  %v324_v9 = vld [vmem:[%s1129_s5 + $0x28] sm:$0xff] (!%p251_p9)  ;;  %s869_s29 = smov (!%p251_p9), 64   ;;  %vm871_vm0 = vmmov (!%p251_p9), 0  }
   0xf   : > { %709 = vmatprep.subr.bf16.mxu0 (!%p251_p9), %v867_v3  ;;  %v713_v7 = vpack.c.bf16 (!%p251_p9), %v322_v6, %v321_v5  ;;  %v716_v14 = vpack.c.bf16 (!%p251_p9), %v324_v9, %v323_v8  ;;  %v325_v15 = vld [vmem:[%s1129_s5 + $0x30] sm:$0xff] (!%p251_p9)  ;;  %v326_v16 = vld [vmem:[%s1129_s5 + $0x38] sm:$0xff] (!%p251_p9)  ;;  %v327_v19 = vld [vmem:[%s1129_s5 + $0x40] sm:$0xff] (!%p251_p9)  ;;  %v872_v28 = vmov (!%p251_p9), 0.0   ;;  %vm380_vm1 = vcmask (!%p251_p9), 261120   ;;  %s646_s28 = sshll.u32 (!%p251_p9), %s930_s25, 4 }
  0x10   : > { %741 = vmatpush3.bf16.msra.mxu1 (!%p251_p9), %v710_v4  ;;  %711 = vmatpush3.bf16.msra.mxu0 (!%p251_p9), %v710_v4  ;;  %v719_v18 = vpack.c.bf16 (!%p251_p9), %v326_v16, %v325_v15  ;;  %v328_v20 = vld [vmem:[%s1129_s5 + $0x48] sm:$0xff] (!%p251_p9)  ;;  %v329_v22 = vld [vmem:[%s1129_s5 + $0x50] sm:$0xff] (!%p251_p9)  ;;  %v330_v23 = vld [vmem:[%s1129_s5 + $0x58] sm:$0xff] (!%p251_p9)  ;;  %vm384_vm2 = vcmask (!%p251_p9), 523264   ;;  %v336_v39 = vand.u32 (!%p251_p9), 127, %v335_v36  ;;  %vm388_vm3 = vcmask (!%p251_p9), 785408   ;;  %s1084_s12 = scalar_lea.hbm (!%p251_p9), %s1130_s6, %s646_s28 }
  0x11   : > { %734 = vmatprep.subr.bf16.mxu1 (!%p251_p9), %v867_v3  ;;  %712 = vmatprep.subr.bf16.mxu0 (!%p251_p9), %v867_v3  ;;  %v722_v21 = vpack.c.bf16 (!%p251_p9), %v328_v20, %v327_v19  ;;  %v725_v25 = vpack.c.bf16 (!%p251_p9), %v330_v23, %v329_v22  ;;  %v331_v26 = vld [vmem:[%s1129_s5 + $0x60] sm:$0xff] (!%p251_p9)  ;;  %v332_v27 = vld [vmem:[%s1129_s5 + $0x68] sm:$0xff] (!%p251_p9)  ;;  %v333_v30 = vld [vmem:[%s1129_s5 + $0x70] sm:$0xff] (!%p251_p9)  ;;  %vm507_vm9 = vcmask (!%p251_p9), 7168  }
  0x12   : > { %703 = vmatprep.mubr.msk.f32.mxu1 (!%p251_p9), %vm871_vm0, %v872_v28  ;;  %700 = vmatprep.mubr.msk.f32.mxu0 (!%p251_p9), %vm871_vm0, %v872_v28  ;;  %v728_v29 = vpack.c.bf16 (!%p251_p9), %v332_v27, %v331_v26  ;;  %v334_v31 = vld [vmem:[%s1129_s5 + $0x78] sm:$0xff] (!%p251_p9) }
  0x13   : > { %v731_v32 = vpack.c.bf16 (!%p251_p9), %v334_v31, %v333_v30 }
  0x14   : > { %742 = vmatpush3.bf16.msra.mxu1 (!%p251_p9), %v713_v7  ;;  %714 = vmatpush3.bf16.msra.mxu0 (!%p251_p9), %v713_v7 }
  0x15   : > { %s295_s17 = scalar_select %p294_p10, %s930_s25, 1  ;;  %735 = vmatprep.subr.bf16.mxu1 %v867_v3  ;;  %715 = vmatprep.subr.bf16.mxu0 %v867_v3 }
  0x16   : > { %s873_s25 = smov [#allocation2]  }
  0x17   : > { %s973_s18 = sshll.u32 %s295_s17, 3  ;;  %s868_s17 = smov 32  }
  0x18   : > { %s297_s10 = scalar_lea.vmem %s1124_s0, %s973_s18  ;;  %s313_s13 = scalar_lea.vmem %s1128_s4, %s973_s18  ;;  %743 = vmatpush3.bf16.msra.mxu1 %v716_v14  ;;  %717 = vmatpush3.bf16.msra.mxu0 %v716_v14 }
  0x19   : > { %v991_v10 = vld [vmem:[%s297_s10] sm:$0xff]  ;;  %s305_s16 = scalar_lea.vmem %s1126_s2, %s973_s18  ;;  %736 = vmatprep.subr.bf16.mxu1 %v867_v3  ;;  %s309_s15 = scalar_lea.vmem %s1127_s3, %s973_s18  ;;  %718 = vmatprep.subr.bf16.mxu0 %v867_v3 }
  0x1a   : > { %v318_v11 = vld [vmem:[%s313_s13] sm:$0xff]  ;;  %353 = vrot.lane.b32.xlu0 %v991_v10, %s868_s17  ;;  %s301_s19 = scalar_lea.vmem %s1125_s1, %s973_s18  ;;  %s292_s18 = sand.u32 1, %s856_s22  }
  0x1b   : > { %v337_v12 = vmul.u32 32, %v318_v11  ;;  %v999_v13 = vld [vmem:[%s305_s16] sm:$0xff]  ;;  %s870_s16 = smov 96   ;;  %s293_s20 = scalar_lea.vmem [#allocation2], %s292_s18 }
  0x1c   : > { %355 = vrot.lane.b32.xlu1 %v999_v13, %s868_s17  ;;  %744 = vmatpush3.bf16.msra.mxu1 %v719_v18  ;;  %v317_v24 = vld [vmem:[%s309_s15] sm:$0xff]  ;;  %s533_s26 = sshll.u32 %s293_s20, 4  ;;  %s806_s14 = sshll.u32 %s873_s25, 4  ;;  %s1079_s26 = int_to_ptr.vmem [resolvable:$true] %s533_s26  ;;  %s807_s14 = int_to_ptr.vmem [resolvable:$false] %s806_s14 }
  0x1d   : > { %v342_v17 = vadd.s32 32, %v337_v12  ;;  %737 = vmatprep.subr.bf16.mxu1 %v867_v3  ;;  %720 = vmatpush3.bf16.msra.mxu0 %v719_v18  ;;  %v315_v61 = vld [vmem:[%s301_s19] sm:$0xff]  ;;  %s802_s13 = scalar_lea.vmem %s1079_s26, 16  ;;  %s808_s15 = scalar_lea.vmem %s807_s14, 32 }
  0x1e   : > { %339 = vperm.xlu0 %797, %v337_v12   ;;  %721 = vmatprep.subr.bf16.mxu0 %v867_v3  ;;  %p803_p11 = scmp.ne.s32.totalorder %s1079_s26, %s802_s13  ;;  %p809_p0 = scmp.lt.s32.totalorder %s1079_s26, %s807_s14 }
  0x1f   : > { %p810_p1 = scmp.lt.s32.totalorder %s808_s15, %s802_s13 }
  0x20   : > { %364 = vrot.lane.b32.xlu1 %v999_v13, %s869_s29  ;;  %745 = vmatpush3.bf16.msra.mxu1 %v722_v21  ;;  %p804_p12 = pnand %p803_p11, %p947_p5 }
  0x21   : > { %738 = vmatprep.subr.bf16.mxu1 %v867_v3  ;;  %723 = vmatpush3.bf16.msra.mxu0 %v722_v21  ;;  %p811_p2 = por %p810_p1, %p809_p0 }
  0x22   : > { %344 = vperm.xlu0 %797, %v342_v17   ;;  %724 = vmatprep.subr.bf16.mxu0 %v867_v3  ;;  %p805_p13 = pneg %p804_p12 }
  0x24   : > { %373 = vrot.lane.b32.xlu1 %v999_v13, %s870_s16  ;;  %746 = vmatpush3.bf16.msra.mxu1 %v725_v25  ;;  %p812_p3 = pnand %p811_p2, %p805_p13 }
  0x25   : > { %739 = vmatprep.subr.bf16.mxu1 %v867_v3  ;;  %726 = vmatpush3.bf16.msra.mxu0 %v725_v25 }
  0x26   : > { %362 = vrot.lane.b32.xlu0 %v991_v10, %s869_s29  ;;  %727 = vmatprep.subr.bf16.mxu0 %v867_v3 }
  0x28   : > { %357 = vrot.lane.b32.xlu1 %v317_v24, %s868_s17  ;;  %747 = vmatpush3.bf16.msra.mxu1 %v728_v29  ;;  %s521_s17 = scalar_lea.sflag [#allocation3], %s292_s18 }
  0x29   : > { %740 = vmatprep.subr.bf16.mxu1 %v867_v3  ;;  %729 = vmatpush3.bf16.msra.mxu0 %v728_v29 }
  0x2a   : > { %371 = vrot.lane.b32.xlu0 %v991_v10, %s870_s16  ;;  %730 = vmatprep.subr.bf16.mxu0 %v867_v3 }
  0x2c   : > { %366 = vrot.lane.b32.xlu1 %v317_v24, %s869_s29  ;;  %748 = vmatpush3.bf16.msra.mxu1 %v731_v32 }
  0x2d   : > { %732 = vmatpush3.bf16.msra.mxu0 %v731_v32 }
  0x2e   : > { %375 = vrot.lane.b32.xlu0 %v317_v24, %s870_s16 }
  0x8c   : > { %v354_v34 = vpop.permute.xlu0 %353 }
  0x8d   : > { %v381_v48 = vsel %vm380_vm1, %v991_v10, %v354_v34 }
  0x8e   : > { %v356_v33 = vpop.permute.xlu1 %355 }
  0x8f   : > { %v382_v38 = vsel %vm380_vm1, %v999_v13, %v356_v33 }
  0x92   : > { %v365_v35 = vpop.permute.xlu1 %364 }
  0x93   : > { %v386_v41 = vsel %vm384_vm2, %v382_v38, %v365_v35 }
  0x96   : > { %v374_v40 = vpop.permute.xlu1 %373 }
  0x97   : > { %v390_v43 = vsel %vm388_vm3, %v386_v41, %v374_v40 }
  0x9a   : > { %v358_v45 = vpop.permute.xlu1 %357 }
  0x9b   : > { %v383_v51 = vsel %vm380_vm1, %v317_v24, %v358_v45 }
  0x9d   : > { %v340_v37 = vpop.permute.xlu0 %339 }
  0x9e   : > { %vm341_vm4 = vcmp.ge.s32.totalorder %v336_v39, %v340_v37  ;;  %v367_v52 = vpop.permute.xlu1 %366 }
  0x9f   : > { %v387_v55 = vsel %vm384_vm2, %v383_v51, %v367_v52 }
  0xa1   : > { %v345_v42 = vpop.permute.xlu0 %344 }
  0xa2   : > { %vm346_vm5 = vcmp.lt.s32.totalorder %v336_v39, %v345_v42 }
  0xa3   : > { %vm347_vm6 = vmand %vm341_vm4, %vm346_vm5 }
  0xa4   : > { %v645_v44 = vsel %vm347_vm6, 1.0, %v872_v28 }
  0xa5   : > { %v363_v46 = vpop.permute.xlu0 %362  ;;  %v393_v47 = vmul.f32 %v645_v44, %v390_v43 }
  0xa6   : > { %v385_v49 = vsel %vm384_vm2, %v381_v48, %v363_v46 }
  0xa7   : > { %704 = vmatmul.mubr.f32.vlgmr.msra.gmra.mrb[0].mxu1 %v393_v47 }
  0xa8   : > { %706 = vmatprep.mubr.msk.f32.mxu1 %vm871_vm0, %v872_v28 }
  0xa9   : > { %v372_v50 = vpop.permute.xlu0 %371 }
  0xaa   : > { %v389_v53 = vsel %vm388_vm3, %v385_v49, %v372_v50 }
  0xab   : > { %v392_v54 = vmul.f32 %v645_v44, %v389_v53 }
  0xad   : > { %701 = vmatmul.mubr.f32.vlgmr.msra.gmra.mrb[0].mxu0 %v392_v54  ;;  %v376_v56 = vpop.permute.xlu0 %375 }
  0xae   : > { %v391_v57 = vsel %vm388_vm3, %v387_v55, %v376_v56 }
  0xaf   : > { %v394_v58 = vmul.f32 %v645_v44, %v391_v57 }
  0xb1   : > { %707 = vmatmul.mubr.f32.gmra.mrb[2].mxu1 %v394_v58 }
 0x17a   : > { %v466_v59 = vpop.f32.mrb[0].mxu1 }
 0x17b   : > { %v705_v60 = vpop.f32.mrb[1].mxu1 }
 0x180   : > { %v461_v62 = vpop.f32.mrb[0].mxu0 }
 0x181   : > { %v475_v63 = vadd.f32 %v461_v62, %v315_v61  ;;  %v702_v0 = vpop.f32.mrb[1].mxu0 }
 0x183   : > { %v476_v1 = vsub.f32 %v475_v63, %v466_v59 }
 0x184   : > { %v471_v2 = vpop.f32.mrb[2].mxu1 }
 0x185   : > { %v481_v3 = vsub.f32 %v475_v63, %v471_v2  ;;  %v708_v4 = vpop.f32.mrb[3].mxu1  ;;  %v477_v5 = vmul.f32 %v476_v1, %v476_v1 }
 0x187   : > { %v482_v6 = vmul.f32 %v481_v3, %v481_v3  ;;  %v478_v7 = vsel %vm380_vm1, %v477_v5, 0.0 }
 0x188   : > { %479 = vadd.xlane.f32.xlu1 %v478_v7 }
 0x189   : > { %v483_v8 = vsel %vm380_vm1, %v482_v6, 0.0 }
 0x18a   : > { %484 = vadd.xlane.f32.xlu0 %v483_v8 }
 0x215   : > { %v480_v9 = vpop.xlane.xlu1 %479 }
 0x217   : > { %v485_v10 = vpop.xlane.xlu0 %484 }
 0x218   : > { %v486_v11 = vsub.f32 %v480_v9, %v485_v10 }
 0x21a   : > { %v487_v12 = vsub.f32 0.0, %v486_v11 }
 0x21c   : > { %v491_v13 = vand.u32 2147483647, %v487_v12  ;;  %v488_v24 = vmax.f32 %v487_v12, 0.0  ;;  %vm489_vm8 = vcmp.ne.f32.partialorder %v487_v12, %v487_v12 }
 0x21e   : > { %v492_v14 = vsub.f32 0.0, %v491_v13 }
 0x220   : > { %v493_v15 = vmul.f32 1.442695, %v492_v14 }
 0x222   : > { %798 = vpow2.f32 %v493_v15 }
 0x22c   : > { %v799_v16 = vpop.eup %798 }
 0x22d   : > { %v495_v17 = vadd.f32 1.0, %v799_v16  ;;  %v498_v18 = vmul.f32 -0.5, %v799_v16  ;;  %v501_v20 = vand.u32 2147483647, %v799_v16 }
 0x22f   : > { %800 = vlog2.f32 %v495_v17  ;;  %v499_v19 = vadd.f32 1.0, %v498_v18  ;;  %vm502_vm7 = vcmp.lt.f32.partialorder %v501_v20, 0.0004427343 }
 0x231   : > { %v500_v23 = vmul.f32 %v799_v16, %v499_v19 }
 0x239   : > { %v801_v21 = vpop.eup %800 }
 0x23a   : > { %v497_v22 = vmul.f32 0.6931472, %v801_v21 }
 0x23c   : > { %v503_v25 = vsel %vm502_vm7, %v500_v23, %v497_v22 }
 0x23d   : > { %v504_v26 = vadd.f32 %v503_v25, %v488_v24 }
 0x23f   : > { %v505_v27 = vsel %vm489_vm8, %v487_v12, %v504_v26 }
 0x240   : > { %v506_v28 = vsub.f32 0.0, %v505_v27 }
 0x242   : > { %v508_v29 = vsel %vm507_vm9, %v506_v28, 0.0 }
 0x243   : > { %509 = vadd.xlane.f32.xlu0 %v508_v29 }
 0x2d0   : > { %v510_v30 = vpop.xlane.xlu0 %509 }
 0x2d1   : > { %v511_v31 = vrot.slane %v510_v30, 4 }
 0x2d3   : > { %v512_v32 = vadd.f32 %v511_v31, %v510_v30 }
 0x2d5   : > { %v513_v33 = vrot.slane %v512_v32, 2 }
 0x2d7   : > { %v514_v34 = vadd.f32 %v513_v33, %v512_v32 }
 0x2d9   : > { %v515_v35 = vrot.slane %v514_v34, 1 }
 0x2db   : > { %v516_v36 = vadd.f32 %v515_v35, %v514_v34 }
 0x2dd   : > { %749 = vpush %v516_v36 }
 0x30e   : > { %s750_s9 = spop %749 }
 0x30f   : > { %v518_v37 = vstv %s750_s9 }
 0x310   : > { %519 = vst [vmem:[%s293_s20] sm:$0x1] %v518_v37 }
 0x311   : > { %815 = shalt.err (!%p812_p3)
}
 0x312   : > { %s816_s29 = scalar_lea.hbm %s1084_s12, 16  ;;  %s820_s18 = scalar_lea.hbm %s1130_s6, 32 }
 0x313   : > { %p817_p4 = scmp.ne.s32.totalorder %s1084_s12, %s816_s29  ;;  %p821_p9 = scmp.lt.u32.totalorder %s1084_s12, %s1130_s6 }
 0x314   : > { %p822_p10 = scmp.lt.u32.totalorder %s820_s18, %s816_s29  ;;  %p824_p12 = scmp.lt.u32.totalorder %s816_s29, %s1084_s12 }
 0x315   : > { %p818_p7 = pnand %p817_p4, %p947_p5 }
 0x316   : > { %p823_p11 = por %p822_p10, %p821_p9 }
 0x317   : > { %p819_p8 = pneg %p818_p7 }
 0x318   : > { %p825_p13 = por %p824_p12, %p823_p11 }
 0x31a   : > { %p826_p0 = pnand %p825_p13, %p819_p8 }
 0x31c   : > { %829 = shalt.err (!%p826_p0)
}
 0x31d   : > { %751 = dma.vmem_to_hbm [thread:$0]  (%p947_p5), %s1079_s26, 16, %s1084_s12, %s521_s17  }
 0x31e PF: > { %p757_p1 = scmp.ge.s32.totalorder %s864_s24, 2  ;;  %s545_s9 = sand.u32 1, %s852_s21  }
 0x31f   : > { %s546_s10 = scalar_lea.sflag [#allocation3], %s545_s9 }
 0x320   : > { %p754_p2 = pnand %p757_p1, %p951_p6 }
 0x322   : > { %847 = dma.done.wait (!%p754_p2), %s546_s10, 16  }
 0x323   : > { %849 = vsyncadd (!%p754_p2), %s546_s10, 4294967280  ;;  %p16_p3 = scmp.ge.s32.totalorder %s934_s27, 4   ;;  %s1133_s21 = smov %s856_s22 }
 0x324   : > { %s1134_s22 = smov %s860_s23  ;;  %s1135_s23 = smov %s945_s30 }
 0x325   : > { %s1136_s24 = smov %s934_s27  ;;  %18 = sbr.rel (!%p16_p3) target bundleno = 3 (0x3), region = 91 }
 0x32c   :  { %550 = vsyncpa [#allocation3], 1 }
 0x32d   :  { %552 = vsyncpa [#allocation3 + $0x1], 1 }

</bundles_post_ra>
